<compile_context>
chip_gen: v7x
topology: tpu7x:2x2x1
jax: 0.10.0
libtpu: 0.0.40
codegen_flags: <defaults>
</compile_context>

<pallas_src>
import jax
import jax.numpy as jnp
from jax.experimental import pallas as pl
from jax.experimental.pallas import tpu as pltpu


def _round_up(x, m):
    return (x + m - 1) // m * m


# ----------------------------------------------------------------------------- kernels


def _fused_kernel(x1_ref, x2_ref, wa_ref, wb_ref, b_ref, o_ref):
    """out = x1 @ Wa + x2 @ Wb + b  (all f32; Wa/Wb are the pre-fused lin1@lin3 weights)."""
    acc = jnp.dot(x1_ref[...], wa_ref[...], preferred_element_type=jnp.float32)
    acc = acc + jnp.dot(x2_ref[...], wb_ref[...], preferred_element_type=jnp.float32)
    o_ref[...] = acc + b_ref[...]


def _dense2_kernel(x1_ref, x2_ref, w1_ref, b1_ref, w3a_ref, w3b_ref, b3_ref, o_ref):
    """lin1 on both modalities (shared, VMEM-resident W1), then lin3 as two dots against the two
    halves of W3 (no in-kernel lane concat).  act = Identity; dropout = eval-mode no-op."""
    w1 = w1_ref[...]
    y1 = jnp.dot(x1_ref[...], w1, preferred_element_type=jnp.float32) + b1_ref[...]
    y2 = jnp.dot(x2_ref[...], w1, preferred_element_type=jnp.float32) + b1_ref[...]
    # TODO(synk): non-identity act_func / training-mode dropout not implemented (default cfg, eval).
    acc = jnp.dot(y1, w3a_ref[...], preferred_element_type=jnp.float32)
    acc = acc + jnp.dot(y2, w3b_ref[...], preferred_element_type=jnp.float32)
    o_ref[...] = acc + b3_ref[...]


# ----------------------------------------------------------------------------- tiling


def _choose_batch_tile(B, per_row_bytes, target_block_bytes):
    """Rows per grid step: big enough to amortize per-step overhead (~0.35 us), small enough to fit
    the VMEM budget, and (when the batch allows it) leaving >= 2 grid steps so the "parallel" batch
    axis can be sharded across v7x's two TensorCores."""
    tb = max(8, target_block_bytes // max(per_row_bytes, 1))
    tb = min(tb, max(8, _round_up(pl.cdiv(B, 2), 8)))
    if tb >= B:
        return B, 1                       # single block == full array dims (always legal)
    tb = max(8, tb // 8 * 8)              # sublane-aligned partial blocks; ragged tail is masked
    return tb, pl.cdiv(B, tb)


# ----------------------------------------------------------------------------- wrapper


def dummy_multimodal_dense2_forward(x1, x2, params, *, act_func=None,
                                    fuse_lin1_lin3=True,
                                    target_block_bytes=4 << 20):
    """x1, x2: (B, num_nodes, input_dim).  Returns logits (B, n_classes), float32."""
    if act_func:
        # TODO(synk): non-identity activations / training-mode dropout are not implemented.
        raise NotImplementedError("only the default Identity activation (eval mode) is supported")

    B = x1.shape[0]
    inp1 = x1.reshape(B, -1).astype(jnp.float32)   # free view for contiguous f32 inputs
    inp2 = x2.reshape(B, -1).astype(jnp.float32)
    D = inp1.shape[1]
    assert inp2.shape[1] == D, "lin1 is shared: both modalities must flatten to the same feature dim"

    w1 = params["w1"].astype(jnp.float32)          # (D, H)
    b1 = params["b1"].astype(jnp.float32)          # (1, H)
    w3 = params["w3"].astype(jnp.float32)          # (2H, C)
    b3 = params["b3"].astype(jnp.float32)          # (1, C)
    H = w1.shape[1]
    C = w3.shape[1]
    w3a, w3b = w3[:H], w3[H:]

    if fuse_lin1_lin3:
        # Affine collapse (valid only because act = Identity and dropout is an eval no-op).
        # Pre-multiplication done in full f32 before anything reaches the kernel.
        wa = w1 @ w3a                              # (D, C)
        wb = w1 @ w3b                              # (D, C)
        bf = b1 @ (w3a + w3b) + b3                 # (1, C)
        weights = (wa, wb, bf)
        weight_specs = [
            pl.BlockSpec((D, C), lambda i: (0, 0)),
            pl.BlockSpec((D, C), lambda i: (0, 0)),
            pl.BlockSpec((1, C), lambda i: (0, 0)),
        ]
        kernel = _fused_kernel
        per_row_scratch = 0
        flops = 2 * (2 * B * D * C)
        weight_bytes = (wa.size + wb.size + bf.size) * 4
    else:
        weights = (w1, b1, w3a, w3b, b3)
        weight_specs = [
            pl.BlockSpec((D, H), lambda i: (0, 0)),
            pl.BlockSpec((1, H), lambda i: (0, 0)),
            pl.BlockSpec((H, C), lambda i: (0, 0)),
            pl.BlockSpec((H, C), lambda i: (0, 0)),
            pl.BlockSpec((1, C), lambda i: (0, 0)),
        ]
        kernel = _dense2_kernel
        per_row_scratch = 2 * H * 4                # y1 / y2 temporaries
        flops = 2 * (2 * B * D * H) + 2 * (2 * B * H * C)
        weight_bytes = (w1.size + b1.size + w3.size + b3.size) * 4

    # Batch tiling from a VMEM budget (double-buffered f32 x1/x2 inputs + f32 output block).
    per_row_bytes = 2 * (2 * D * 4) + 2 * (C * 4) + per_row_scratch
    TB, G = _choose_batch_tile(B, per_row_bytes, target_block_bytes)

    io_bytes = 2 * B * D * 4 + B * C * 4 + weight_bytes
    vmem_need = TB * per_row_bytes + 2 * weight_bytes + (2 << 20)
    vmem_limit = int(min(max(vmem_need, 16 << 20), 48 << 20))   # <= 48 MiB: safe on v7x (64 MiB)

    out = pl.pallas_call(
        kernel,
        out_shape=jax.ShapeDtypeStruct((B, C), jnp.float32),
        grid=(G,),
        in_specs=[
            pl.BlockSpec((TB, D), lambda i: (i, 0)),      # modality-1 rows (streamed, f32)
            pl.BlockSpec((TB, D), lambda i: (i, 0)),      # modality-2 rows (streamed, f32)
            *weight_specs,                                # weights / biases: VMEM-resident
        ],
        out_specs=pl.BlockSpec((TB, C), lambda i: (i, 0)),    # unpadded; lane dim == n_classes
        compiler_params=pltpu.CompilerParams(
            dimension_semantics=("parallel",),            # shard batch tiles across TCs (v7x)
            vmem_limit_bytes=vmem_limit,
        ),
        cost_estimate=pl.CostEstimate(
            flops=int(flops), transcendentals=0, bytes_accessed=int(io_bytes)),
    )(inp1, inp2, *weights)
    return out


# ----------------------------------------------------------------------------- params & self-test


def init_params(key, input_dim_1, num_nodes_1, hidden, n_classes):
    """Deterministic synthetic parameters (torch-Linear-like uniform init), stored f32.
    Note: the reference module also defines lin2, which is unused in forward — omitted here."""
    D = input_dim_1 * num_nodes_1
    k1, k2, k3, k4 = jax.random.split(key, 4)
    lim1 = 1.0 / jnp.sqrt(D)
    lim3 = 1.0 / jnp.sqrt(2 * hidden)
    return {
        "w1": jax.random.uniform(k1, (D, hidden), jnp.float32, -lim1, lim1),
        "b1": jax.random.uniform(k2, (1, hidden), jnp.float32, -lim1, lim1),
        "w3": jax.random.uniform(k3, (2 * hidden, n_classes), jnp.float32, -lim3, lim3),
        "b3": jax.random.uniform(k4, (1, n_classes), jnp.float32, -lim3, lim3),
    }


if __name__ == "__main__":
    input_dim_1, num_nodes_1 = 4, 8          # flattened feature dim D = 32
    hidden, n_classes = 32, 4

    key = jax.random.PRNGKey(0)
    kp, kx = jax.random.split(key)
    params = init_params(kp, input_dim_1, num_nodes_1, hidden, n_classes)

    def reference(x1, x2):
        inp1 = x1.reshape(x1.shape[0], -1)
        inp2 = x2.reshape(x2.shape[0], -1)
        y1 = inp1 @ params["w1"] + params["b1"]
        y2 = inp2 @ params["w1"] + params["b1"]
        return jnp.concatenate([y1, y2], axis=-1) @ params["w3"] + params["b3"]

    fwd = jax.jit(dummy_multimodal_dense2_forward,
                  static_argnames=("act_func", "fuse_lin1_lin3", "target_block_bytes"))

    # (a) Small batch (single full-batch block): fused (default) and non-fused kernels.
    B = 2
    k1, k2 = jax.random.split(kx)
    x1 = jax.random.normal(k1, (B, num_nodes_1, input_dim_1), jnp.float32)
    x2 = jax.random.normal(k2, (B, num_nodes_1, input_dim_1), jnp.float32)
    ref = reference(x1, x2)
    out_fused = jax.block_until_ready(fwd(x1, x2, params))
    out_plain = jax.block_until_ready(fwd(x1, x2, params, fuse_lin1_lin3=False))
    assert out_fused.shape == (B, n_classes)
    assert jnp.allclose(out_fused, ref, atol=2e-2, rtol=2e-2), "fused kernel mismatch vs f32 reference"
    assert jnp.allclose(out_plain, ref, atol=2e-2, rtol=2e-2), "kernel mismatch vs f32 reference"
    assert jnp.allclose(out_fused, out_plain, atol=2e-2, rtol=2e-2), "fused vs non-fused mismatch"

    # (b) Larger, non-tile-aligned batch: multi-step grid with a ragged (masked) tail tile.
    B = 37
    k3, k4 = jax.random.split(k1)
    x1 = jax.random.normal(k3, (B, num_nodes_1, input_dim_1), jnp.float32)
    x2 = jax.random.normal(k4, (B, num_nodes_1, input_dim_1), jnp.float32)
    ref = reference(x1, x2)
    out_tiled = jax.block_until_ready(
        fwd(x1, x2, params, target_block_bytes=4096))   # tiny budget -> TB=8, G=5, 5-row tail
    assert out_tiled.shape == (B, n_classes)
    assert jnp.allclose(out_tiled, ref, atol=2e-2, rtol=2e-2), "ragged-tile kernel mismatch vs f32 reference"

    print("KERNEL_OK")
</pallas_src>

<mosaic_0001>
module attributes {stable_mosaic.version = 11 : i64} {
  func.func @_fused_kernel(%arg0: i32, %arg1: memref<2x32xf32, #tpu.memory_space<vmem>>, %arg2: memref<2x32xf32, #tpu.memory_space<vmem>>, %arg3: memref<32x4xf32, #tpu.memory_space<vmem>>, %arg4: memref<32x4xf32, #tpu.memory_space<vmem>>, %arg5: memref<1x4xf32, #tpu.memory_space<vmem>>, %arg6: memref<2x4xf32, #tpu.memory_space<vmem>>) attributes {dimension_semantics = [#tpu.dimension_semantics<parallel>], iteration_bounds = array<i64: 1>, scalar_prefetch = 0 : i64, scratch_operands = 0 : i64, tpu.core_type = #tpu.core_type<tc>, window_params = [{transform_indices = @transform_0, window_bounds = array<i64: 2, 32>}, {transform_indices = @transform_1, window_bounds = array<i64: 2, 32>}, {pipeline_mode = #tpu.pipeline_mode<synchronous>, transform_indices = @transform_2, window_bounds = array<i64: 32, 4>}, {pipeline_mode = #tpu.pipeline_mode<synchronous>, transform_indices = @transform_3, window_bounds = array<i64: 32, 4>}, {pipeline_mode = #tpu.pipeline_mode<synchronous>, transform_indices = @transform_4, window_bounds = array<i64: 1, 4>}, {transform_indices = @transform_5, window_bounds = array<i64: 2, 4>}]} {
    %c0 = arith.constant 0 : index
    %c0_0 = arith.constant 0 : index
    %0 = vector.load %arg1[%c0, %c0_0] : memref<2x32xf32, #tpu.memory_space<vmem>>, vector<2x32xf32>
    %c0_1 = arith.constant 0 : index
    %c0_2 = arith.constant 0 : index
    %1 = vector.load %arg3[%c0_1, %c0_2] : memref<32x4xf32, #tpu.memory_space<vmem>>, vector<32x4xf32>
    %cst = arith.constant dense<0.000000e+00> : vector<2x4xf32>
    %2 = tpu.matmul %0, %1, %cst {dimension_numbers = #tpu.dot_dimension_numbers<[1], [0], [0], [1], [0, 0, 1, 1], [], []>} : vector<2x32xf32>, vector<32x4xf32>, vector<2x4xf32> -> vector<2x4xf32>
    %c0_3 = arith.constant 0 : index
    %c0_4 = arith.constant 0 : index
    %3 = vector.load %arg2[%c0_3, %c0_4] : memref<2x32xf32, #tpu.memory_space<vmem>>, vector<2x32xf32>
    %c0_5 = arith.constant 0 : index
    %c0_6 = arith.constant 0 : index
    %4 = vector.load %arg4[%c0_5, %c0_6] : memref<32x4xf32, #tpu.memory_space<vmem>>, vector<32x4xf32>
    %cst_7 = arith.constant dense<0.000000e+00> : vector<2x4xf32>
    %5 = tpu.matmul %3, %4, %cst_7 {dimension_numbers = #tpu.dot_dimension_numbers<[1], [0], [0], [1], [0, 0, 1, 1], [], []>} : vector<2x32xf32>, vector<32x4xf32>, vector<2x4xf32> -> vector<2x4xf32>
    %6 = arith.addf %2, %5 : vector<2x4xf32>
    %c0_8 = arith.constant 0 : index
    %c0_9 = arith.constant 0 : index
    %7 = vector.load %arg5[%c0_8, %c0_9] : memref<1x4xf32, #tpu.memory_space<vmem>>, vector<1x4xf32>
    %8 = vector.broadcast %7 : vector<1x4xf32> to vector<2x4xf32>
    %9 = arith.addf %6, %8 : vector<2x4xf32>
    %c0_10 = arith.constant 0 : index
    %c0_11 = arith.constant 0 : index
    %10 = vector.load %arg6[%c0_10, %c0_11] : memref<2x4xf32, #tpu.memory_space<vmem>>, vector<2x4xf32>
    tpu.vector_store %arg6[%c0_10, %c0_11], %9 {strides = array<i32>} : memref<2x4xf32, #tpu.memory_space<vmem>>, vector<2x4xf32>,
    return
  }
  func.func @transform_0(%arg0: i32) -> (i32, i32) {
    %c0_i32 = arith.constant 0 : i32
    %c0_i32_0 = arith.constant 0 : i32
    return %arg0, %c0_i32 : i32, i32
  }
  func.func @transform_1(%arg0: i32) -> (i32, i32) {
    %c0_i32 = arith.constant 0 : i32
    %c0_i32_0 = arith.constant 0 : i32
    return %arg0, %c0_i32 : i32, i32
  }
  func.func @transform_2(%arg0: i32) -> (i32, i32) {
    %c0_i32 = arith.constant 0 : i32
    %c0_i32_0 = arith.constant 0 : i32
    %c0_i32_1 = arith.constant 0 : i32
    return %c0_i32, %c0_i32_0 : i32, i32
  }
  func.func @transform_3(%arg0: i32) -> (i32, i32) {
    %c0_i32 = arith.constant 0 : i32
    %c0_i32_0 = arith.constant 0 : i32
    %c0_i32_1 = arith.constant 0 : i32
    return %c0_i32, %c0_i32_0 : i32, i32
  }
  func.func @transform_4(%arg0: i32) -> (i32, i32) {
    %c0_i32 = arith.constant 0 : i32
    %c0_i32_0 = arith.constant 0 : i32
    %c0_i32_1 = arith.constant 0 : i32
    return %c0_i32, %c0_i32_0 : i32, i32
  }
  func.func @transform_5(%arg0: i32) -> (i32, i32) {
    %c0_i32 = arith.constant 0 : i32
    %c0_i32_0 = arith.constant 0 : i32
    return %arg0, %c0_i32 : i32, i32
  }
}

</mosaic_0001>

<bundles_post_ra>
// kernel: dummy_multimodal_dense2_forward.1
= control target key start
LH: loop header
LB: loop body
LE: loop exit
PB: predicated region body
PF: predicated region fallthrough
CT: control target
= control target key end

     0   :  { %v277_v3 = vmov 0.0|0.0   ;;  %vm278_vm0 = vmmov 0   ;;  %v279_v11 = vmov 0.0   ;;  %s356_s0 = inlined_call_operand.vmem [shape: f32[2,32], index: 0, kind: input, shape index: {}]   ;;  %s357_s1 = inlined_call_operand.vmem [shape: f32[2,32], index: 1, kind: input, shape index: {}]   ;;  %s358_s2 = inlined_call_operand.vmem [shape: f32[32,4], index: 2, kind: input, shape index: {}]   ;;  %s359_s3 = inlined_call_operand.vmem [shape: f32[32,4], index: 3, kind: input, shape index: {}]   ;;  %s360_s4 = inlined_call_operand.vmem [shape: f32[1,4], index: 4, kind: input, shape index: {}]   ;;  %s361_s5 = inlined_call_operand.hbm [shape: f32[2,4], index: 5, kind: output, shape index: {}]  }
   0x1   :  { %v27_v0 = vld [vmem:[%s359_s3] sm:$0xff]  ;;  %v28_v1 = vld [vmem:[%s359_s3 + $0x8] sm:$0xff]  ;;  %237 = vmatprep.subr.bf16.mxu0 %v277_v3  ;;  %243 = vmatprep.subr.bf16.mxu1 %v277_v3  ;;  %v29_v6 = vld [vmem:[%s359_s3 + $0x10] sm:$0xff] }
   0x2   :  { %v22_v2 = vld [vmem:[%s358_s2] sm:$0xff]  ;;  %v238_v4 = vpack.c.bf16 %v28_v1, %v27_v0  ;;  %v23_v5 = vld [vmem:[%s358_s2 + $0x8] sm:$0xff]  ;;  %v30_v7 = vld [vmem:[%s359_s3 + $0x18] sm:$0xff]  ;;  %223 = vmatprep.mubr.msk.f32.mxu0 %vm278_vm0, %v279_v11  ;;  %234 = vmatprep.mubr.msk.f32.mxu1 %vm278_vm0, %v279_v11 }
   0x3   :  { %v244_v8 = vpack.c.bf16 %v23_v5, %v22_v2  ;;  %v24_v9 = vld [vmem:[%s358_s2 + $0x10] sm:$0xff]  ;;  %v25_v10 = vld [vmem:[%s358_s2 + $0x18] sm:$0xff]  ;;  %v241_v12 = vpack.c.bf16 %v30_v7, %v29_v6 }
   0x4   :  { %239 = vmatpush3.bf16.msra.mxu0 %v238_v4 }
   0x5   :  { %10 = vsyncpa [#allocation3], 0  ;;  %245 = vmatpush3.bf16.msra.mxu1 %v244_v8  ;;  %240 = vmatprep.subr.bf16.mxu0 %v277_v3  ;;  %v247_v13 = vpack.c.bf16 %v25_v10, %v24_v9  ;;  %v26_v14 = vld [vmem:[%s357_s1] sm:$0x3]  ;;  %vm31_vm1 = vcmask 261120   ;;  %s280_s13 = smov [#allocation2]  }
   0x6   :  { %246 = vmatprep.subr.bf16.mxu1 %v277_v3  ;;  %v21_v15 = vld [vmem:[%s356_s0] sm:$0x3]  ;;  %s194_s14 = sshll.u32 %s280_s13, 4  ;;  %vm186_vm2 = vcmask 25600   ;;  %s195_s14 = int_to_ptr.vmem [resolvable:$true] %s194_s14 }
   0x7   :  { %v204_v18 = vld [vmem:[%s360_s4] ss:$0 sm:$0xff]  ;;  %s253_s1 = scalar_lea.vmem %s195_s14, 32  ;;  %p258_p1 = scmp.lt.s32.totalorder %s195_s14, %s195_s14 }
   0x8   :  { %242 = vmatpush3.bf16.msra.mxu0 %v241_v12  ;;  %p254_p0 = scmp.ne.s32.totalorder %s195_s14, %s253_s1  ;;  %p259_p2 = scmp.lt.s32.totalorder %s253_s1, %s253_s1 }
   0x9   :  { %248 = vmatpush3.bf16.msra.mxu1 %v247_v13 }
   0xa   :  { %p260_p3 = por %p259_p2, %p258_p1 }
   0xb   :  { %224 = vmatmul.mubr.msk.f32.vlgmr.msra.gmra.mrb[0].mxu0 %vm31_vm1, %v26_v14 }
   0xc   :  { %235 = vmatmul.mubr.msk.f32.vlgmr.msra.gmra.mrb[0].mxu1 %vm31_vm1, %v21_v15  ;;  %p261_p4 = pnand %p260_p3, %p254_p0 }
  0xde   :  { %v101_v16 = vpop.f32.mrb[0].mxu0 }
  0xdf   :  { %v174_v17 = vpop.f32.mrb[0].mxu1  ;;  %v225_v19 = vpop.f32.mrb[1].mxu0 }
  0xe0   :  { %v175_v20 = vadd.f32 %v174_v17, %v101_v16  ;;  %v236_v21 = vpop.f32.mrb[1].mxu1 }
  0xe2   :  { %v185_v22 = vadd.f32 %v204_v18, %v175_v20 }
  0xe4   :  { %187 = vst.msk [vmem:[#allocation2] sm:$0x3] %vm186_vm2, %v185_v22 }
  0xe5   :  { %264 = shalt.err (!%p261_p4)
}
  0xe6   :  { %s265_s4 = scalar_lea.hbm %s361_s5, 32 }
  0xe7   :  { %p266_p5 = scmp.ne.s32.totalorder %s361_s5, %s265_s4  ;;  %p269_p6 = scmp.lt.u32.totalorder %s265_s4, %s361_s5 }
  0xe9   :  { %p271_p7 = pnand %p269_p6, %p266_p5 }
  0xeb   :  { %274 = shalt.err (!%p271_p7)
}
  0xec   :  { %197 = dma.vmem_to_hbm [thread:$0]  %s195_s14, 32, %s361_s5, [#allocation3]  }
  0xed   :  { %275 = dma.done.wait [#allocation3], 32  }
  0xee   :  { %276 = vsyncadd [#allocation3], 4294967264 }
  0xef   :  { %201 = vsyncpa [#allocation3], 1 }

</bundles_post_ra>
